<compile_context>
chip_gen: v7x
topology: tpu7x:2x2x1
jax: 0.10.0
libtpu: 0.0.40
codegen_flags: <defaults>
</compile_context>

<pallas_src>
import functools
import math

import jax
import jax.numpy as jnp
from jax import lax
from jax.experimental import pallas as pl
from jax.experimental.pallas import tpu as pltpu


def _erf_approx(x):
    # Abramowitz & Stegun 7.1.26 rational approximation, |err| <= 1.5e-7.
    # Only mul/add/exp/abs/where/reciprocal -> guaranteed Mosaic lowering.
    a1 = 0.254829592
    a2 = -0.284496736
    a3 = 1.421413741
    a4 = -1.453152027
    a5 = 1.061405429
    p = 0.3275911
    ax = jnp.abs(x)
    # pl.reciprocal lowers to the EUP (off the VALU); approx=True would be even
    # cheaper but costs ~1e-2 GELU drift, so keep the full-precision reciprocal.
    t = pl.reciprocal(1.0 + p * ax)
    poly = ((((a5 * t + a4) * t + a3) * t + a2) * t + a1) * t
    e = 1.0 - poly * jnp.exp(-ax * ax)
    return jnp.where(x >= 0.0, e, -e)


def _gelu_exact(x):
    # PyTorch nn.GELU() default is the erf-based ("exact") GELU.
    return 0.5 * x * (1.0 + _erf_approx(x * (1.0 / math.sqrt(2.0))))


def _fusion_kernel(H, W, masks_ref, f1_ref, f2_ref, wa_ref, wb_ref, b1_ref,
                   w3_ref, b3_ref, out_ref, patch_ref):
    """One block of `ipb` images per grid step, channels-on-sublanes layout.

    masks_ref : (9, HW)          f32, per-tap boundary masks (grid-invariant)
    f1_ref    : (ipb, Cin, HW)   mxu_dtype, features_1 (NCHW is a free reshape)
    f2_ref    : (ipb, Cin, HW)   mxu_dtype, features_2
    wa_ref    : (Cout, Cin)      1x1 conv weight half for f1 (BN folded)
    wb_ref    : (Cout, Cin)      1x1 conv weight half for f2 (BN folded)
    b1_ref    : (Cout, 1)        f32, 1x1 conv bias (BN folded)
    w3_ref    : (Cout, 9*Cout)   3x3 conv as an im2col matrix, tap-major rows
    b3_ref    : (Cout, 1)        f32, 3x3 conv bias
    out_ref   : (ipb, Cout, HW)  f32
    patch_ref : (9*Cout, HW)     f32 VMEM scratch holding the im2col operand
    """
    HW = H * W
    ipb = f1_ref.shape[0]
    cout = out_ref.shape[1]

    wa = wa_ref[...]
    wb = wb_ref[...]
    w3 = w3_ref[...]
    b1 = b1_ref[...]
    b3 = b3_ref[...]
    masks = masks_ref[...]

    for n in range(ipb):  # static unroll over the (small) per-block batch
        # cat([f1, f2], dim=channel) + 1x1 conv + folded BN  ==  two matmuls.
        y = (jnp.dot(wa, f1_ref[n], preferred_element_type=jnp.float32)
             + jnp.dot(wb, f2_ref[n], preferred_element_type=jnp.float32)
             + b1)
        y = _gelu_exact(y)                                    # (Cout, HW) f32

        # ---- 3x3 conv (padding=1) as one im2col matmul -------------------
        # Each tap is an XLU lane-rotation of y; boundary masks kill the
        # row/column wrap-around introduced by the flat HW indexing.
        for t in range(9):
            dy, dx = t // 3 - 1, t % 3 - 1
            off = dy * W + dx                    # tap[p] = y[p + off] (masked)
            tap = y if off == 0 else pltpu.roll(y, shift=(-off) % HW, axis=1)
            if t != 4:                           # center tap needs no mask
                tap = tap * masks[t:t + 1, :]
            patch_ref[t * cout:(t + 1) * cout, :] = tap

        z = jnp.dot(w3, patch_ref[...].astype(w3.dtype),
                    preferred_element_type=jnp.float32)       # (Cout, HW)

        # Residual: y + conv3x3(y) + b3.
        out_ref[n] = (y + z + b3).astype(out_ref.dtype)


def featuremap_fusion(features_1, features_2, params, *, bn_eps=1e-5,
                      mxu_dtype=jnp.bfloat16):
    """features_1 / features_2: (N, Cin, H, W), NCHW like the PyTorch module."""
    N, C, H, W = features_1.shape
    HW = H * W
    conv1_w = params["conv1_w"]          # (Cout, 2*Cin, 1, 1)
    conv1_b = params["conv1_b"]          # (Cout,)
    conv3_w = params["conv3_w"]          # (Cout, Cout, 3, 3)
    conv3_b = params["conv3_b"]          # (Cout,)
    cout = conv1_w.shape[0]

    # Fold inference-mode BatchNorm into the 1x1 conv.
    scale = params["bn_gamma"] * lax.rsqrt(params["bn_var"] + bn_eps)
    w_fused = conv1_w[:, :, 0, 0] * scale[:, None]                 # (Cout, 2C)
    b_fused = (conv1_b - params["bn_mean"]) * scale + params["bn_beta"]

    # Split so the channel concat never materializes; keep (Cout, Cin) layout.
    wa = w_fused[:, :C].astype(mxu_dtype)
    wb = w_fused[:, C:].astype(mxu_dtype)
    b1 = b_fused.reshape(cout, 1).astype(jnp.float32)

    # 3x3 conv as one im2col matrix: row index = tap*(Cout) + in_channel,
    # tap order t = (ky)*3 + (kx), matching the kernel's patch construction.
    w3 = jnp.transpose(conv3_w, (0, 2, 3, 1)).reshape(cout, 9 * cout)
    w3 = w3.astype(mxu_dtype)
    b3 = conv3_b.reshape(cout, 1).astype(jnp.float32)

    # NCHW -> (N, C, HW): a FREE reshape (no HBM transpose pass).
    f1 = features_1.reshape(N, C, HW).astype(mxu_dtype)
    f2 = features_2.reshape(N, C, HW).astype(mxu_dtype)

    # Grid-invariant boundary masks for the 9 taps (computed once, not per step).
    pos = jnp.arange(HW, dtype=jnp.int32)
    row = pos // W
    col = pos % W

    def _valid(dy, dx):
        m = jnp.ones((HW,), jnp.bool_)
        if dy == -1:
            m = m & (row >= 1)
        if dy == 1:
            m = m & (row <= H - 2)
        if dx == -1:
            m = m & (col >= 1)
        if dx == 1:
            m = m & (col <= W - 2)
        return m

    masks = jnp.stack([_valid(dy, dx) for dy in (-1, 0, 1) for dx in (-1, 0, 1)],
                      axis=0).astype(jnp.float32)                  # (9, HW)

    # Fold the whole (small) batch into a single grid step when it comfortably
    # fits VMEM; otherwise one image per step ("parallel" for megacore / v7x).
    # TODO(synk): production-sized feature maps on v7x (64 MiB VMEM) would also
    #             want a spatial row-tile grid axis with a 1-row halo.
    itemsize = jnp.dtype(mxu_dtype).itemsize
    per_img_bytes = HW * (2 * C * itemsize + cout * 4) + 9 * cout * HW * 4
    ipb = N if N * per_img_bytes <= (8 << 20) else 1
    grid = (N // ipb,)

    kernel = functools.partial(_fusion_kernel, H, W)
    out = pl.pallas_call(
        kernel,
        out_shape=jax.ShapeDtypeStruct((N, cout, HW), jnp.float32),
        grid=grid,
        in_specs=[
            pl.BlockSpec((9, HW), lambda i: (0, 0)),
            pl.BlockSpec((ipb, C, HW), lambda i: (i, 0, 0)),
            pl.BlockSpec((ipb, C, HW), lambda i: (i, 0, 0)),
            pl.BlockSpec((cout, C), lambda i: (0, 0)),
            pl.BlockSpec((cout, C), lambda i: (0, 0)),
            pl.BlockSpec((cout, 1), lambda i: (0, 0)),
            pl.BlockSpec((cout, 9 * cout), lambda i: (0, 0)),
            pl.BlockSpec((cout, 1), lambda i: (0, 0)),
        ],
        out_specs=pl.BlockSpec((ipb, cout, HW), lambda i: (i, 0, 0)),
        scratch_shapes=[pltpu.VMEM((9 * cout, HW), jnp.float32)],
        compiler_params=pltpu.CompilerParams(
            dimension_semantics=("parallel",)),
    )(masks, f1, f2, wa, wb, b1, w3, b3)

    # (N, Cout, HW) -> NCHW: again a free reshape, no transpose back.
    return out.reshape(N, cout, H, W)


def _reference(features_1, features_2, params, bn_eps=1e-5):
    """Plain-XLA reference with the exact module semantics (inference BN)."""
    dn = ("NCHW", "OIHW", "NCHW")
    x = jnp.concatenate([features_1, features_2], axis=1)
    y = lax.conv_general_dilated(x, params["conv1_w"], (1, 1), "VALID",
                                 dimension_numbers=dn)
    y = y + params["conv1_b"][None, :, None, None]
    scale = params["bn_gamma"] / jnp.sqrt(params["bn_var"] + bn_eps)
    y = ((y - params["bn_mean"][None, :, None, None])
         * scale[None, :, None, None] + params["bn_beta"][None, :, None, None])
    y = jax.nn.gelu(y, approximate=False)
    z = lax.conv_general_dilated(y, params["conv3_w"], (1, 1),
                                 ((1, 1), (1, 1)), dimension_numbers=dn)
    z = z + params["conv3_b"][None, :, None, None]
    return y + z


if __name__ == "__main__":
    N, C, H, W = 2, 4, 16, 16      # batch=2, input_dim=4, spatial=16
    Cout = 8                       # out_dim=8

    key = jax.random.PRNGKey(0)
    ks = jax.random.split(key, 10)
    features_1 = jax.random.normal(ks[0], (N, C, H, W), jnp.float32)
    features_2 = jax.random.normal(ks[1], (N, C, H, W), jnp.float32)
    params = {
        "conv1_w": 0.3 * jax.random.normal(ks[2], (Cout, 2 * C, 1, 1), jnp.float32),
        "conv1_b": 0.1 * jax.random.normal(ks[3], (Cout,), jnp.float32),
        "bn_gamma": 1.0 + 0.2 * jax.random.normal(ks[4], (Cout,), jnp.float32),
        "bn_beta": 0.1 * jax.random.normal(ks[5], (Cout,), jnp.float32),
        "bn_mean": 0.1 * jax.random.normal(ks[6], (Cout,), jnp.float32),
        "bn_var": jax.random.uniform(ks[7], (Cout,), jnp.float32, 0.5, 1.5),
        "conv3_w": 0.2 * jax.random.normal(ks[8], (Cout, Cout, 3, 3), jnp.float32),
        "conv3_b": 0.1 * jax.random.normal(ks[9], (Cout,), jnp.float32),
    }

    ref = _reference(features_1, features_2, params)

    # Default path: bf16 MXU operands (v5e/v6e/v7x recommendation), f32 math.
    out_bf16 = featuremap_fusion(features_1, features_2, params)
    out_bf16 = jax.block_until_ready(out_bf16)
    assert out_bf16.shape == ref.shape, (out_bf16.shape, ref.shape)
    assert jnp.allclose(out_bf16, ref, rtol=5e-2, atol=5e-2), \
        float(jnp.max(jnp.abs(out_bf16 - ref)))

    # Exact-precision path to validate kernel structure tightly.
    out_f32 = featuremap_fusion(features_1, features_2, params,
                                mxu_dtype=jnp.float32)
    out_f32 = jax.block_until_ready(out_f32)
    assert jnp.allclose(out_f32, ref, rtol=1e-3, atol=1e-3), \
        float(jnp.max(jnp.abs(out_f32 - ref)))

    print("KERNEL_OK")
</pallas_src>

<mosaic_0001>
module attributes {stable_mosaic.version = 11 : i64} {
  func.func @_fusion_kernel(%arg0: i32, %arg1: memref<9x256xf32, #tpu.memory_space<vmem>>, %arg2: memref<2x4x256xbf16, #tpu.memory_space<vmem>>, %arg3: memref<2x4x256xbf16, #tpu.memory_space<vmem>>, %arg4: memref<8x4xbf16, #tpu.memory_space<vmem>>, %arg5: memref<8x4xbf16, #tpu.memory_space<vmem>>, %arg6: memref<8x1xf32, #tpu.memory_space<vmem>>, %arg7: memref<8x72xbf16, #tpu.memory_space<vmem>>, %arg8: memref<8x1xf32, #tpu.memory_space<vmem>>, %arg9: memref<2x8x256xf32, #tpu.memory_space<vmem>>, %arg10: memref<72x256xf32, #tpu.memory_space<vmem>>) attributes {dimension_semantics = [#tpu.dimension_semantics<parallel>], iteration_bounds = array<i64: 1>, scalar_prefetch = 0 : i64, scratch_operands = 1 : i64, tpu.core_type = #tpu.core_type<tc>, window_params = [{pipeline_mode = #tpu.pipeline_mode<synchronous>, transform_indices = @transform_0, window_bounds = array<i64: 9, 256>}, {transform_indices = @transform_1, window_bounds = array<i64: 2, 4, 256>}, {transform_indices = @transform_2, window_bounds = array<i64: 2, 4, 256>}, {pipeline_mode = #tpu.pipeline_mode<synchronous>, transform_indices = @transform_3, window_bounds = array<i64: 8, 4>}, {pipeline_mode = #tpu.pipeline_mode<synchronous>, transform_indices = @transform_4, window_bounds = array<i64: 8, 4>}, {pipeline_mode = #tpu.pipeline_mode<synchronous>, transform_indices = @transform_5, window_bounds = array<i64: 8, 1>}, {pipeline_mode = #tpu.pipeline_mode<synchronous>, transform_indices = @transform_6, window_bounds = array<i64: 8, 72>}, {pipeline_mode = #tpu.pipeline_mode<synchronous>, transform_indices = @transform_7, window_bounds = array<i64: 8, 1>}, {transform_indices = @transform_8, window_bounds = array<i64: 2, 8, 256>}]} {
    %c0 = arith.constant 0 : index
    %c0_0 = arith.constant 0 : index
    %0 = vector.load %arg4[%c0, %c0_0] : memref<8x4xbf16, #tpu.memory_space<vmem>>, vector<8x4xbf16>
    %c0_1 = arith.constant 0 : index
    %c0_2 = arith.constant 0 : index
    %1 = vector.load %arg5[%c0_1, %c0_2] : memref<8x4xbf16, #tpu.memory_space<vmem>>, vector<8x4xbf16>
    %c0_3 = arith.constant 0 : index
    %c0_4 = arith.constant 0 : index
    %2 = vector.load %arg7[%c0_3, %c0_4] : memref<8x72xbf16, #tpu.memory_space<vmem>>, vector<8x72xbf16>
    %c0_5 = arith.constant 0 : index
    %c0_6 = arith.constant 0 : index
    %3 = vector.load %arg6[%c0_5, %c0_6] : memref<8x1xf32, #tpu.memory_space<vmem>>, vector<8x1xf32>
    %c0_7 = arith.constant 0 : index
    %c0_8 = arith.constant 0 : index
    %4 = vector.load %arg8[%c0_7, %c0_8] : memref<8x1xf32, #tpu.memory_space<vmem>>, vector<8x1xf32>
    %c0_9 = arith.constant 0 : index
    %c0_10 = arith.constant 0 : index
    %5 = vector.load %arg1[%c0_9, %c0_10] : memref<9x256xf32, #tpu.memory_space<vmem>>, vector<9x256xf32>
    %c0_11 = arith.constant 0 : index
    %c0_12 = arith.constant 0 : index
    %c0_13 = arith.constant 0 : index
    %6 = vector.load %arg2[%c0_11, %c0_12, %c0_13] : memref<2x4x256xbf16, #tpu.memory_space<vmem>>, vector<1x4x256xbf16>
    %7 = vector.shape_cast %6 : vector<1x4x256xbf16> to vector<4x256xbf16>
    %cst = arith.constant dense<0.000000e+00> : vector<8x256xf32>
    %8 = tpu.matmul %0, %7, %cst {dimension_numbers = #tpu.dot_dimension_numbers<[1], [0], [0], [1], [0, 0, 1, 1], [], []>} : vector<8x4xbf16>, vector<4x256xbf16>, vector<8x256xf32> -> vector<8x256xf32>
    %c0_14 = arith.constant 0 : index
    %c0_15 = arith.constant 0 : index
    %c0_16 = arith.constant 0 : index
    %9 = vector.load %arg3[%c0_14, %c0_15, %c0_16] : memref<2x4x256xbf16, #tpu.memory_space<vmem>>, vector<1x4x256xbf16>
    %10 = vector.shape_cast %9 : vector<1x4x256xbf16> to vector<4x256xbf16>
    %cst_17 = arith.constant dense<0.000000e+00> : vector<8x256xf32>
    %11 = tpu.matmul %1, %10, %cst_17 {dimension_numbers = #tpu.dot_dimension_numbers<[1], [0], [0], [1], [0, 0, 1, 1], [], []>} : vector<8x4xbf16>, vector<4x256xbf16>, vector<8x256xf32> -> vector<8x256xf32>
    %12 = arith.addf %8, %11 : vector<8x256xf32>
    %13 = vector.broadcast %3 : vector<8x1xf32> to vector<8x256xf32>
    %14 = arith.addf %12, %13 : vector<8x256xf32>
    %cst_18 = arith.constant 5.000000e-01 : f32
    %15 = vector.broadcast %cst_18 : f32 to vector<8x256xf32>
    %16 = arith.mulf %15, %14 : vector<8x256xf32>
    %cst_19 = arith.constant 0.707106769 : f32
    %17 = vector.broadcast %cst_19 : f32 to vector<8x256xf32>
    %18 = arith.mulf %14, %17 : vector<8x256xf32>
    %19 = math.absf %18 : vector<8x256xf32>
    %cst_20 = arith.constant 0.327591091 : f32
    %20 = vector.broadcast %cst_20 : f32 to vector<8x256xf32>
    %21 = arith.mulf %20, %19 : vector<8x256xf32>
    %cst_21 = arith.constant 1.000000e+00 : f32
    %22 = vector.broadcast %cst_21 : f32 to vector<8x256xf32>
    %23 = arith.addf %22, %21 : vector<8x256xf32>
    %24 = tpu.reciprocal %23 : vector<8x256xf32> -> vector<8x256xf32>
    %cst_22 = arith.constant 1.06140542 : f32
    %25 = vector.broadcast %cst_22 : f32 to vector<8x256xf32>
    %26 = arith.mulf %25, %24 : vector<8x256xf32>
    %cst_23 = arith.constant -1.45315206 : f32
    %27 = vector.broadcast %cst_23 : f32 to vector<8x256xf32>
    %28 = arith.addf %26, %27 : vector<8x256xf32>
    %29 = arith.mulf %28, %24 : vector<8x256xf32>
    %cst_24 = arith.constant 1.42141378 : f32
    %30 = vector.broadcast %cst_24 : f32 to vector<8x256xf32>
    %31 = arith.addf %29, %30 : vector<8x256xf32>
    %32 = arith.mulf %31, %24 : vector<8x256xf32>
    %cst_25 = arith.constant -0.284496725 : f32
    %33 = vector.broadcast %cst_25 : f32 to vector<8x256xf32>
    %34 = arith.addf %32, %33 : vector<8x256xf32>
    %35 = arith.mulf %34, %24 : vector<8x256xf32>
    %cst_26 = arith.constant 0.254829586 : f32
    %36 = vector.broadcast %cst_26 : f32 to vector<8x256xf32>
    %37 = arith.addf %35, %36 : vector<8x256xf32>
    %38 = arith.mulf %37, %24 : vector<8x256xf32>
    %cst_27 = arith.constant 0.000000e+00 : f32
    %39 = vector.broadcast %cst_27 : f32 to vector<8x256xf32>
    %40 = arith.subf %39, %19 : vector<8x256xf32>
    %41 = arith.mulf %40, %19 : vector<8x256xf32>
    %42 = math.exp %41 : vector<8x256xf32>
    %43 = arith.mulf %38, %42 : vector<8x256xf32>
    %cst_28 = arith.constant 1.000000e+00 : f32
    %44 = vector.broadcast %cst_28 : f32 to vector<8x256xf32>
    %45 = arith.subf %44, %43 : vector<8x256xf32>
    %cst_29 = arith.constant 0.000000e+00 : f32
    %46 = vector.broadcast %cst_29 : f32 to vector<8x256xf32>
    %47 = arith.cmpf oge, %18, %46 : vector<8x256xf32>
    %cst_30 = arith.constant 0.000000e+00 : f32
    %48 = vector.broadcast %cst_30 : f32 to vector<8x256xf32>
    %49 = arith.subf %48, %45 : vector<8x256xf32>
    %50 = arith.select %47, %45, %49 : vector<8x256xi1>, vector<8x256xf32>
    %cst_31 = arith.constant 1.000000e+00 : f32
    %51 = vector.broadcast %cst_31 : f32 to vector<8x256xf32>
    %52 = arith.addf %51, %50 : vector<8x256xf32>
    %53 = arith.mulf %16, %52 : vector<8x256xf32>
    %c17_i32 = arith.constant 17 : i32
    %54 = tpu.dynamic_rotate %53 by %c17_i32 dim 1 : vector<8x256xf32>, i32 -> vector<8x256xf32>
    %55 = vector.extract_strided_slice %5 {offsets = [0, 0], sizes = [1, 256], strides = [1, 1]} : vector<9x256xf32> to vector<1x256xf32>
    %56 = vector.broadcast %55 : vector<1x256xf32> to vector<8x256xf32>
    %57 = arith.mulf %54, %56 : vector<8x256xf32>
    %c0_32 = arith.constant 0 : index
    %c0_33 = arith.constant 0 : index
    %58 = vector.load %arg10[%c0_32, %c0_33] : memref<72x256xf32, #tpu.memory_space<vmem>>, vector<8x256xf32>
    tpu.vector_store %arg10[%c0_32, %c0_33], %57 {strides = array<i32>} : memref<72x256xf32, #tpu.memory_space<vmem>>, vector<8x256xf32>,
    %c16_i32 = arith.constant 16 : i32
    %59 = tpu.dynamic_rotate %53 by %c16_i32 dim 1 : vector<8x256xf32>, i32 -> vector<8x256xf32>
    %60 = vector.extract_strided_slice %5 {offsets = [1, 0], sizes = [1, 256], strides = [1, 1]} : vector<9x256xf32> to vector<1x256xf32>
    %61 = vector.broadcast %60 : vector<1x256xf32> to vector<8x256xf32>
    %62 = arith.mulf %59, %61 : vector<8x256xf32>
    %c8 = arith.constant 8 : index
    %c0_34 = arith.constant 0 : index
    %63 = vector.load %arg10[%c8, %c0_34] : memref<72x256xf32, #tpu.memory_space<vmem>>, vector<8x256xf32>
    tpu.vector_store %arg10[%c8, %c0_34], %62 {strides = array<i32>} : memref<72x256xf32, #tpu.memory_space<vmem>>, vector<8x256xf32>,
    %c15_i32 = arith.constant 15 : i32
    %64 = tpu.dynamic_rotate %53 by %c15_i32 dim 1 : vector<8x256xf32>, i32 -> vector<8x256xf32>
    %65 = vector.extract_strided_slice %5 {offsets = [2, 0], sizes = [1, 256], strides = [1, 1]} : vector<9x256xf32> to vector<1x256xf32>
    %66 = vector.broadcast %65 : vector<1x256xf32> to vector<8x256xf32>
    %67 = arith.mulf %64, %66 : vector<8x256xf32>
    %c16 = arith.constant 16 : index
    %c0_35 = arith.constant 0 : index
    %68 = vector.load %arg10[%c16, %c0_35] : memref<72x256xf32, #tpu.memory_space<vmem>>, vector<8x256xf32>
    tpu.vector_store %arg10[%c16, %c0_35], %67 {strides = array<i32>} : memref<72x256xf32, #tpu.memory_space<vmem>>, vector<8x256xf32>,
    %c1_i32 = arith.constant 1 : i32
    %69 = tpu.dynamic_rotate %53 by %c1_i32 dim 1 : vector<8x256xf32>, i32 -> vector<8x256xf32>
    %70 = vector.extract_strided_slice %5 {offsets = [3, 0], sizes = [1, 256], strides = [1, 1]} : vector<9x256xf32> to vector<1x256xf32>
    %71 = vector.broadcast %70 : vector<1x256xf32> to vector<8x256xf32>
    %72 = arith.mulf %69, %71 : vector<8x256xf32>
    %c24 = arith.constant 24 : index
    %c0_36 = arith.constant 0 : index
    %73 = vector.load %arg10[%c24, %c0_36] : memref<72x256xf32, #tpu.memory_space<vmem>>, vector<8x256xf32>
    tpu.vector_store %arg10[%c24, %c0_36], %72 {strides = array<i32>} : memref<72x256xf32, #tpu.memory_space<vmem>>, vector<8x256xf32>,
    %c32 = arith.constant 32 : index
    %c0_37 = arith.constant 0 : index
    %74 = vector.load %arg10[%c32, %c0_37] : memref<72x256xf32, #tpu.memory_space<vmem>>, vector<8x256xf32>
    tpu.vector_store %arg10[%c32, %c0_37], %53 {strides = array<i32>} : memref<72x256xf32, #tpu.memory_space<vmem>>, vector<8x256xf32>,
    %c255_i32 = arith.constant 255 : i32
    %75 = tpu.dynamic_rotate %53 by %c255_i32 dim 1 : vector<8x256xf32>, i32 -> vector<8x256xf32>
    %76 = vector.extract_strided_slice %5 {offsets = [5, 0], sizes = [1, 256], strides = [1, 1]} : vector<9x256xf32> to vector<1x256xf32>
    %77 = vector.broadcast %76 : vector<1x256xf32> to vector<8x256xf32>
    %78 = arith.mulf %75, %77 : vector<8x256xf32>
    %c40 = arith.constant 40 : index
    %c0_38 = arith.constant 0 : index
    %79 = vector.load %arg10[%c40, %c0_38] : memref<72x256xf32, #tpu.memory_space<vmem>>, vector<8x256xf32>
    tpu.vector_store %arg10[%c40, %c0_38], %78 {strides = array<i32>} : memref<72x256xf32, #tpu.memory_space<vmem>>, vector<8x256xf32>,
    %c241_i32 = arith.constant 241 : i32
    %80 = tpu.dynamic_rotate %53 by %c241_i32 dim 1 : vector<8x256xf32>, i32 -> vector<8x256xf32>
    %81 = vector.extract_strided_slice %5 {offsets = [6, 0], sizes = [1, 256], strides = [1, 1]} : vector<9x256xf32> to vector<1x256xf32>
    %82 = vector.broadcast %81 : vector<1x256xf32> to vector<8x256xf32>
    %83 = arith.mulf %80, %82 : vector<8x256xf32>
    %c48 = arith.constant 48 : index
    %c0_39 = arith.constant 0 : index
    %84 = vector.load %arg10[%c48, %c0_39] : memref<72x256xf32, #tpu.memory_space<vmem>>, vector<8x256xf32>
    tpu.vector_store %arg10[%c48, %c0_39], %83 {strides = array<i32>} : memref<72x256xf32, #tpu.memory_space<vmem>>, vector<8x256xf32>,
    %c240_i32 = arith.constant 240 : i32
    %85 = tpu.dynamic_rotate %53 by %c240_i32 dim 1 : vector<8x256xf32>, i32 -> vector<8x256xf32>
    %86 = vector.extract_strided_slice %5 {offsets = [7, 0], sizes = [1, 256], strides = [1, 1]} : vector<9x256xf32> to vector<1x256xf32>
    %87 = vector.broadcast %86 : vector<1x256xf32> to vector<8x256xf32>
    %88 = arith.mulf %85, %87 : vector<8x256xf32>
    %c56 = arith.constant 56 : index
    %c0_40 = arith.constant 0 : index
    %89 = vector.load %arg10[%c56, %c0_40] : memref<72x256xf32, #tpu.memory_space<vmem>>, vector<8x256xf32>
    tpu.vector_store %arg10[%c56, %c0_40], %88 {strides = array<i32>} : memref<72x256xf32, #tpu.memory_space<vmem>>, vector<8x256xf32>,
    %c239_i32 = arith.constant 239 : i32
    %90 = tpu.dynamic_rotate %53 by %c239_i32 dim 1 : vector<8x256xf32>, i32 -> vector<8x256xf32>
    %91 = vector.extract_strided_slice %5 {offsets = [8, 0], sizes = [1, 256], strides = [1, 1]} : vector<9x256xf32> to vector<1x256xf32>
    %92 = vector.broadcast %91 : vector<1x256xf32> to vector<8x256xf32>
    %93 = arith.mulf %90, %92 : vector<8x256xf32>
    %c64 = arith.constant 64 : index
    %c0_41 = arith.constant 0 : index
    %94 = vector.load %arg10[%c64, %c0_41] : memref<72x256xf32, #tpu.memory_space<vmem>>, vector<8x256xf32>
    tpu.vector_store %arg10[%c64, %c0_41], %93 {strides = array<i32>} : memref<72x256xf32, #tpu.memory_space<vmem>>, vector<8x256xf32>,
    %c0_42 = arith.constant 0 : index
    %c0_43 = arith.constant 0 : index
    %95 = vector.load %arg10[%c0_42, %c0_43] : memref<72x256xf32, #tpu.memory_space<vmem>>, vector<72x256xf32>
    %96 = arith.truncf %95 : vector<72x256xf32> to vector<72x256xbf16>
    %cst_44 = arith.constant dense<0.000000e+00> : vector<8x256xf32>
    %97 = tpu.matmul %2, %96, %cst_44 {dimension_numbers = #tpu.dot_dimension_numbers<[1], [0], [0], [1], [0, 0, 1, 1], [], []>} : vector<8x72xbf16>, vector<72x256xbf16>, vector<8x256xf32> -> vector<8x256xf32>
    %98 = arith.addf %53, %97 : vector<8x256xf32>
    %99 = vector.broadcast %4 : vector<8x1xf32> to vector<8x256xf32>
    %100 = arith.addf %98, %99 : vector<8x256xf32>
    %c0_45 = arith.constant 0 : index
    %c0_46 = arith.constant 0 : index
    %c0_47 = arith.constant 0 : index
    %101 = vector.load %arg9[%c0_45, %c0_46, %c0_47] : memref<2x8x256xf32, #tpu.memory_space<vmem>>, vector<1x8x256xf32>
    %102 = vector.shape_cast %101 : vector<1x8x256xf32> to vector<8x256xf32>
    %103 = vector.shape_cast %100 : vector<8x256xf32> to vector<1x8x256xf32>
    tpu.vector_store %arg9[%c0_45, %c0_46, %c0_47], %103 {strides = array<i32>} : memref<2x8x256xf32, #tpu.memory_space<vmem>>, vector<1x8x256xf32>,
    %c1 = arith.constant 1 : index
    %c0_48 = arith.constant 0 : index
    %c0_49 = arith.constant 0 : index
    %104 = vector.load %arg2[%c1, %c0_48, %c0_49] : memref<2x4x256xbf16, #tpu.memory_space<vmem>>, vector<1x4x256xbf16>
    %105 = vector.shape_cast %104 : vector<1x4x256xbf16> to vector<4x256xbf16>
    %cst_50 = arith.constant dense<0.000000e+00> : vector<8x256xf32>
    %106 = tpu.matmul %0, %105, %cst_50 {dimension_numbers = #tpu.dot_dimension_numbers<[1], [0], [0], [1], [0, 0, 1, 1], [], []>} : vector<8x4xbf16>, vector<4x256xbf16>, vector<8x256xf32> -> vector<8x256xf32>
    %c1_51 = arith.constant 1 : index
    %c0_52 = arith.constant 0 : index
    %c0_53 = arith.constant 0 : index
    %107 = vector.load %arg3[%c1_51, %c0_52, %c0_53] : memref<2x4x256xbf16, #tpu.memory_space<vmem>>, vector<1x4x256xbf16>
    %108 = vector.shape_cast %107 : vector<1x4x256xbf16> to vector<4x256xbf16>
    %cst_54 = arith.constant dense<0.000000e+00> : vector<8x256xf32>
    %109 = tpu.matmul %1, %108, %cst_54 {dimension_numbers = #tpu.dot_dimension_numbers<[1], [0], [0], [1], [0, 0, 1, 1], [], []>} : vector<8x4xbf16>, vector<4x256xbf16>, vector<8x256xf32> -> vector<8x256xf32>
    %110 = arith.addf %106, %109 : vector<8x256xf32>
    %111 = vector.broadcast %3 : vector<8x1xf32> to vector<8x256xf32>
    %112 = arith.addf %110, %111 : vector<8x256xf32>
    %cst_55 = arith.constant 5.000000e-01 : f32
    %113 = vector.broadcast %cst_55 : f32 to vector<8x256xf32>
    %114 = arith.mulf %113, %112 : vector<8x256xf32>
    %cst_56 = arith.constant 0.707106769 : f32
    %115 = vector.broadcast %cst_56 : f32 to vector<8x256xf32>
    %116 = arith.mulf %112, %115 : vector<8x256xf32>
    %117 = math.absf %116 : vector<8x256xf32>
    %cst_57 = arith.constant 0.327591091 : f32
    %118 = vector.broadcast %cst_57 : f32 to vector<8x256xf32>
    %119 = arith.mulf %118, %117 : vector<8x256xf32>
    %cst_58 = arith.constant 1.000000e+00 : f32
    %120 = vector.broadcast %cst_58 : f32 to vector<8x256xf32>
    %121 = arith.addf %120, %119 : vector<8x256xf32>
    %122 = tpu.reciprocal %121 : vector<8x256xf32> -> vector<8x256xf32>
    %cst_59 = arith.constant 1.06140542 : f32
    %123 = vector.broadcast %cst_59 : f32 to vector<8x256xf32>
    %124 = arith.mulf %123, %122 : vector<8x256xf32>
    %cst_60 = arith.constant -1.45315206 : f32
    %125 = vector.broadcast %cst_60 : f32 to vector<8x256xf32>
    %126 = arith.addf %124, %125 : vector<8x256xf32>
    %127 = arith.mulf %126, %122 : vector<8x256xf32>
    %cst_61 = arith.constant 1.42141378 : f32
    %128 = vector.broadcast %cst_61 : f32 to vector<8x256xf32>
    %129 = arith.addf %127, %128 : vector<8x256xf32>
    %130 = arith.mulf %129, %122 : vector<8x256xf32>
    %cst_62 = arith.constant -0.284496725 : f32
    %131 = vector.broadcast %cst_62 : f32 to vector<8x256xf32>
    %132 = arith.addf %130, %131 : vector<8x256xf32>
    %133 = arith.mulf %132, %122 : vector<8x256xf32>
    %cst_63 = arith.constant 0.254829586 : f32
    %134 = vector.broadcast %cst_63 : f32 to vector<8x256xf32>
    %135 = arith.addf %133, %134 : vector<8x256xf32>
    %136 = arith.mulf %135, %122 : vector<8x256xf32>
    %cst_64 = arith.constant 0.000000e+00 : f32
    %137 = vector.broadcast %cst_64 : f32 to vector<8x256xf32>
    %138 = arith.subf %137, %117 : vector<8x256xf32>
    %139 = arith.mulf %138, %117 : vector<8x256xf32>
    %140 = math.exp %139 : vector<8x256xf32>
    %141 = arith.mulf %136, %140 : vector<8x256xf32>
    %cst_65 = arith.constant 1.000000e+00 : f32
    %142 = vector.broadcast %cst_65 : f32 to vector<8x256xf32>
    %143 = arith.subf %142, %141 : vector<8x256xf32>
    %cst_66 = arith.constant 0.000000e+00 : f32
    %144 = vector.broadcast %cst_66 : f32 to vector<8x256xf32>
    %145 = arith.cmpf oge, %116, %144 : vector<8x256xf32>
    %cst_67 = arith.constant 0.000000e+00 : f32
    %146 = vector.broadcast %cst_67 : f32 to vector<8x256xf32>
    %147 = arith.subf %146, %143 : vector<8x256xf32>
    %148 = arith.select %145, %143, %147 : vector<8x256xi1>, vector<8x256xf32>
    %cst_68 = arith.constant 1.000000e+00 : f32
    %149 = vector.broadcast %cst_68 : f32 to vector<8x256xf32>
    %150 = arith.addf %149, %148 : vector<8x256xf32>
    %151 = arith.mulf %114, %150 : vector<8x256xf32>
    %c17_i32_69 = arith.constant 17 : i32
    %152 = tpu.dynamic_rotate %151 by %c17_i32_69 dim 1 : vector<8x256xf32>, i32 -> vector<8x256xf32>
    %153 = vector.extract_strided_slice %5 {offsets = [0, 0], sizes = [1, 256], strides = [1, 1]} : vector<9x256xf32> to vector<1x256xf32>
    %154 = vector.broadcast %153 : vector<1x256xf32> to vector<8x256xf32>
    %155 = arith.mulf %152, %154 : vector<8x256xf32>
    %c0_70 = arith.constant 0 : index
    %c0_71 = arith.constant 0 : index
    %156 = vector.load %arg10[%c0_70, %c0_71] : memref<72x256xf32, #tpu.memory_space<vmem>>, vector<8x256xf32>
    tpu.vector_store %arg10[%c0_70, %c0_71], %155 {strides = array<i32>} : memref<72x256xf32, #tpu.memory_space<vmem>>, vector<8x256xf32>,
    %c16_i32_72 = arith.constant 16 : i32
    %157 = tpu.dynamic_rotate %151 by %c16_i32_72 dim 1 : vector<8x256xf32>, i32 -> vector<8x256xf32>
    %158 = vector.extract_strided_slice %5 {offsets = [1, 0], sizes = [1, 256], strides = [1, 1]} : vector<9x256xf32> to vector<1x256xf32>
    %159 = vector.broadcast %158 : vector<1x256xf32> to vector<8x256xf32>
    %160 = arith.mulf %157, %159 : vector<8x256xf32>
    %c8_73 = arith.constant 8 : index
    %c0_74 = arith.constant 0 : index
    %161 = vector.load %arg10[%c8_73, %c0_74] : memref<72x256xf32, #tpu.memory_space<vmem>>, vector<8x256xf32>
    tpu.vector_store %arg10[%c8_73, %c0_74], %160 {strides = array<i32>} : memref<72x256xf32, #tpu.memory_space<vmem>>, vector<8x256xf32>,
    %c15_i32_75 = arith.constant 15 : i32
    %162 = tpu.dynamic_rotate %151 by %c15_i32_75 dim 1 : vector<8x256xf32>, i32 -> vector<8x256xf32>
    %163 = vector.extract_strided_slice %5 {offsets = [2, 0], sizes = [1, 256], strides = [1, 1]} : vector<9x256xf32> to vector<1x256xf32>
    %164 = vector.broadcast %163 : vector<1x256xf32> to vector<8x256xf32>
    %165 = arith.mulf %162, %164 : vector<8x256xf32>
    %c16_76 = arith.constant 16 : index
    %c0_77 = arith.constant 0 : index
    %166 = vector.load %arg10[%c16_76, %c0_77] : memref<72x256xf32, #tpu.memory_space<vmem>>, vector<8x256xf32>
    tpu.vector_store %arg10[%c16_76, %c0_77], %165 {strides = array<i32>} : memref<72x256xf32, #tpu.memory_space<vmem>>, vector<8x256xf32>,
    %c1_i32_78 = arith.constant 1 : i32
    %167 = tpu.dynamic_rotate %151 by %c1_i32_78 dim 1 : vector<8x256xf32>, i32 -> vector<8x256xf32>
    %168 = vector.extract_strided_slice %5 {offsets = [3, 0], sizes = [1, 256], strides = [1, 1]} : vector<9x256xf32> to vector<1x256xf32>
    %169 = vector.broadcast %168 : vector<1x256xf32> to vector<8x256xf32>
    %170 = arith.mulf %167, %169 : vector<8x256xf32>
    %c24_79 = arith.constant 24 : index
    %c0_80 = arith.constant 0 : index
    %171 = vector.load %arg10[%c24_79, %c0_80] : memref<72x256xf32, #tpu.memory_space<vmem>>, vector<8x256xf32>
    tpu.vector_store %arg10[%c24_79, %c0_80], %170 {strides = array<i32>} : memref<72x256xf32, #tpu.memory_space<vmem>>, vector<8x256xf32>,
    %c32_81 = arith.constant 32 : index
    %c0_82 = arith.constant 0 : index
    %172 = vector.load %arg10[%c32_81, %c0_82] : memref<72x256xf32, #tpu.memory_space<vmem>>, vector<8x256xf32>
    tpu.vector_store %arg10[%c32_81, %c0_82], %151 {strides = array<i32>} : memref<72x256xf32, #tpu.memory_space<vmem>>, vector<8x256xf32>,
    %c255_i32_83 = arith.constant 255 : i32
    %173 = tpu.dynamic_rotate %151 by %c255_i32_83 dim 1 : vector<8x256xf32>, i32 -> vector<8x256xf32>
    %174 = vector.extract_strided_slice %5 {offsets = [5, 0], sizes = [1, 256], strides = [1, 1]} : vector<9x256xf32> to vector<1x256xf32>
    %175 = vector.broadcast %174 : vector<1x256xf32> to vector<8x256xf32>
    %176 = arith.mulf %173, %175 : vector<8x256xf32>
    %c40_84 = arith.constant 40 : index
    %c0_85 = arith.constant 0 : index
    %177 = vector.load %arg10[%c40_84, %c0_85] : memref<72x256xf32, #tpu.memory_space<vmem>>, vector<8x256xf32>
    tpu.vector_store %arg10[%c40_84, %c0_85], %176 {strides = array<i32>} : memref<72x256xf32, #tpu.memory_space<vmem>>, vector<8x256xf32>,
    %c241_i32_86 = arith.constant 241 : i32
    %178 = tpu.dynamic_rotate %151 by %c241_i32_86 dim 1 : vector<8x256xf32>, i32 -> vector<8x256xf32>
    %179 = vector.extract_strided_slice %5 {offsets = [6, 0], sizes = [1, 256], strides = [1, 1]} : vector<9x256xf32> to vector<1x256xf32>
    %180 = vector.broadcast %179 : vector<1x256xf32> to vector<8x256xf32>
    %181 = arith.mulf %178, %180 : vector<8x256xf32>
    %c48_87 = arith.constant 48 : index
    %c0_88 = arith.constant 0 : index
    %182 = vector.load %arg10[%c48_87, %c0_88] : memref<72x256xf32, #tpu.memory_space<vmem>>, vector<8x256xf32>
    tpu.vector_store %arg10[%c48_87, %c0_88], %181 {strides = array<i32>} : memref<72x256xf32, #tpu.memory_space<vmem>>, vector<8x256xf32>,
    %c240_i32_89 = arith.constant 240 : i32
    %183 = tpu.dynamic_rotate %151 by %c240_i32_89 dim 1 : vector<8x256xf32>, i32 -> vector<8x256xf32>
    %184 = vector.extract_strided_slice %5 {offsets = [7, 0], sizes = [1, 256], strides = [1, 1]} : vector<9x256xf32> to vector<1x256xf32>
    %185 = vector.broadcast %184 : vector<1x256xf32> to vector<8x256xf32>
    %186 = arith.mulf %183, %185 : vector<8x256xf32>
    %c56_90 = arith.constant 56 : index
    %c0_91 = arith.constant 0 : index
    %187 = vector.load %arg10[%c56_90, %c0_91] : memref<72x256xf32, #tpu.memory_space<vmem>>, vector<8x256xf32>
    tpu.vector_store %arg10[%c56_90, %c0_91], %186 {strides = array<i32>} : memref<72x256xf32, #tpu.memory_space<vmem>>, vector<8x256xf32>,
    %c239_i32_92 = arith.constant 239 : i32
    %188 = tpu.dynamic_rotate %151 by %c239_i32_92 dim 1 : vector<8x256xf32>, i32 -> vector<8x256xf32>
    %189 = vector.extract_strided_slice %5 {offsets = [8, 0], sizes = [1, 256], strides = [1, 1]} : vector<9x256xf32> to vector<1x256xf32>
    %190 = vector.broadcast %189 : vector<1x256xf32> to vector<8x256xf32>
    %191 = arith.mulf %188, %190 : vector<8x256xf32>
    %c64_93 = arith.constant 64 : index
    %c0_94 = arith.constant 0 : index
    %192 = vector.load %arg10[%c64_93, %c0_94] : memref<72x256xf32, #tpu.memory_space<vmem>>, vector<8x256xf32>
    tpu.vector_store %arg10[%c64_93, %c0_94], %191 {strides = array<i32>} : memref<72x256xf32, #tpu.memory_space<vmem>>, vector<8x256xf32>,
    %c0_95 = arith.constant 0 : index
    %c0_96 = arith.constant 0 : index
    %193 = vector.load %arg10[%c0_95, %c0_96] : memref<72x256xf32, #tpu.memory_space<vmem>>, vector<72x256xf32>
    %194 = arith.truncf %193 : vector<72x256xf32> to vector<72x256xbf16>
    %cst_97 = arith.constant dense<0.000000e+00> : vector<8x256xf32>
    %195 = tpu.matmul %2, %194, %cst_97 {dimension_numbers = #tpu.dot_dimension_numbers<[1], [0], [0], [1], [0, 0, 1, 1], [], []>} : vector<8x72xbf16>, vector<72x256xbf16>, vector<8x256xf32> -> vector<8x256xf32>
    %196 = arith.addf %151, %195 : vector<8x256xf32>
    %197 = vector.broadcast %4 : vector<8x1xf32> to vector<8x256xf32>
    %198 = arith.addf %196, %197 : vector<8x256xf32>
    %c1_98 = arith.constant 1 : index
    %c0_99 = arith.constant 0 : index
    %c0_100 = arith.constant 0 : index
    %199 = vector.load %arg9[%c1_98, %c0_99, %c0_100] : memref<2x8x256xf32, #tpu.memory_space<vmem>>, vector<1x8x256xf32>
    %200 = vector.shape_cast %199 : vector<1x8x256xf32> to vector<8x256xf32>
    %201 = vector.shape_cast %198 : vector<8x256xf32> to vector<1x8x256xf32>
    tpu.vector_store %arg9[%c1_98, %c0_99, %c0_100], %201 {strides = array<i32>} : memref<2x8x256xf32, #tpu.memory_space<vmem>>, vector<1x8x256xf32>,
    return
  }
  func.func @transform_0(%arg0: i32) -> (i32, i32) {
    %c0_i32 = arith.constant 0 : i32
    %c0_i32_0 = arith.constant 0 : i32
    %c0_i32_1 = arith.constant 0 : i32
    return %c0_i32, %c0_i32_0 : i32, i32
  }
  func.func @transform_1(%arg0: i32) -> (i32, i32, i32) {
    %c0_i32 = arith.constant 0 : i32
    %c0_i32_0 = arith.constant 0 : i32
    %c0_i32_1 = arith.constant 0 : i32
    return %arg0, %c0_i32, %c0_i32_0 : i32, i32, i32
  }
  func.func @transform_2(%arg0: i32) -> (i32, i32, i32) {
    %c0_i32 = arith.constant 0 : i32
    %c0_i32_0 = arith.constant 0 : i32
    %c0_i32_1 = arith.constant 0 : i32
    return %arg0, %c0_i32, %c0_i32_0 : i32, i32, i32
  }
  func.func @transform_3(%arg0: i32) -> (i32, i32) {
    %c0_i32 = arith.constant 0 : i32
    %c0_i32_0 = arith.constant 0 : i32
    %c0_i32_1 = arith.constant 0 : i32
    return %c0_i32, %c0_i32_0 : i32, i32
  }
  func.func @transform_4(%arg0: i32) -> (i32, i32) {
    %c0_i32 = arith.constant 0 : i32
    %c0_i32_0 = arith.constant 0 : i32
    %c0_i32_1 = arith.constant 0 : i32
    return %c0_i32, %c0_i32_0 : i32, i32
  }
  func.func @transform_5(%arg0: i32) -> (i32, i32) {
    %c0_i32 = arith.constant 0 : i32
    %c0_i32_0 = arith.constant 0 : i32
    %c0_i32_1 = arith.constant 0 : i32
    return %c0_i32, %c0_i32_0 : i32, i32
  }
  func.func @transform_6(%arg0: i32) -> (i32, i32) {
    %c0_i32 = arith.constant 0 : i32
    %c0_i32_0 = arith.constant 0 : i32
    %c0_i32_1 = arith.constant 0 : i32
    return %c0_i32, %c0_i32_0 : i32, i32
  }
  func.func @transform_7(%arg0: i32) -> (i32, i32) {
    %c0_i32 = arith.constant 0 : i32
    %c0_i32_0 = arith.constant 0 : i32
    %c0_i32_1 = arith.constant 0 : i32
    return %c0_i32, %c0_i32_0 : i32, i32
  }
  func.func @transform_8(%arg0: i32) -> (i32, i32, i32) {
    %c0_i32 = arith.constant 0 : i32
    %c0_i32_0 = arith.constant 0 : i32
    %c0_i32_1 = arith.constant 0 : i32
    return %arg0, %c0_i32, %c0_i32_0 : i32, i32, i32
  }
}

</mosaic_0001>

<bundles_post_ra>
// kernel: tpu_custom_call.1
= control target key start
LH: loop header
LB: loop body
LE: loop exit
PB: predicated region body
PF: predicated region fallthrough
CT: control target
= control target key end

     0   :  { %13 = vsyncpa [#allocation4], 0  ;;  %s1290_s0 = inlined_call_operand.hbm [shape: f32[9,256], index: 0, kind: input, shape index: {}]   ;;  %s1291_s1 = inlined_call_operand.vmem [shape: bf16[2,4,256], index: 1, kind: input, shape index: {}]   ;;  %s1292_s2 = inlined_call_operand.vmem [shape: bf16[2,4,256], index: 2, kind: input, shape index: {}]   ;;  %s1293_s3 = inlined_call_operand.vmem [shape: bf16[8,4], index: 3, kind: input, shape index: {}]   ;;  %s1294_s4 = inlined_call_operand.vmem [shape: bf16[8,4], index: 4, kind: input, shape index: {}]   ;;  %s1295_s5 = inlined_call_operand.vmem [shape: f32[8,1], index: 5, kind: input, shape index: {}]   ;;  %s1296_s6 = inlined_call_operand.vmem [shape: bf16[8,72], index: 6, kind: input, shape index: {}]   ;;  %s1297_s7 = inlined_call_operand.vmem [shape: f32[8,1], index: 7, kind: input, shape index: {}]   ;;  %s1298_s8 = inlined_call_operand.hbm [shape: f32[2,8,256], index: 8, kind: output, shape index: {}]  }
   0x1   :  { %14 = vsyncpa [#allocation5], 0  ;;  %s931_s27 = smov [#allocation3]   ;;  %s883_s9 = scalar_lea.hbm %s1290_s0, 512 }
   0x2   :  { %s20_s28 = sshll.u32 %s931_s27, 4  ;;  %p884_p0 = scmp.ne.s32.totalorder %s1290_s0, %s883_s9  ;;  %s21_s28 = int_to_ptr.vmem [resolvable:$true] %s20_s28 }
   0x3   :  { %p887_p1 = scmp.lt.u32.totalorder %s883_s9, %s1290_s0 }
   0x5   :  { %p889_p2 = pnand %p887_p1, %p884_p0 }
   0x7   :  { %892 = shalt.err (!%p889_p2)
}
   0x8   :  { %s893_s14 = scalar_lea.vmem %s21_s28, 512  ;;  %p898_p4 = scmp.lt.s32.totalorder %s21_s28, %s21_s28 }
   0x9   :  { %p894_p3 = scmp.ne.s32.totalorder %s21_s28, %s893_s14  ;;  %p899_p5 = scmp.lt.s32.totalorder %s893_s14, %s893_s14 }
   0xb   :  { %p900_p6 = por %p899_p5, %p898_p4 }
   0xd   :  { %p901_p7 = pnand %p900_p6, %p894_p3 }
   0xf   :  { %904 = shalt.err (!%p901_p7)
}
  0x10   :  { %s932_s15 = smov 256   ;;  %s933_s16 = smov 16  }
  0x11   :  { %26 = dma.hbm_to_vmem [thread:$0]  %s1290_s0, 512, %s21_s28, [#allocation4], %s932_s15, %s932_s15, %s933_s16  }
  0x12   :  { %927 = dma.done.wait [#allocation4], 512  }
  0x13   :  { %928 = vsyncadd [#allocation4], 4294966784  ;;  %v934_v0 = vmov 0   ;;  %vm69_vm0 = vcmask 1041408   ;;  %v48_v5 = vld [vmem:[%s1295_s5] sm:$0xff]  ;;  %vm65_vm1 = vcmask 31744  }
  0x14   :  { %108 = vmatprep.mubr.bf16.mxu0 %v934_v0  ;;  %533 = vmatprep.mubr.bf16.mxu1 %v934_v0  ;;  %v833_v1 = vld.sshfl [vmem:[%s1292_s2] sm:$0x33 pattern:$0x76325410]  ;;  %s937_s29 = smov 1   ;;  %s938_s30 = smov 127  }
  0x15   :  { %865 = vset.pattern.permute.xlu0 %v934_v0  ;;  %866 = vset.pattern.permute.xlu1 %v934_v0  ;;  %v64_v2 = vcombine.high %v833_v1, %v833_v1  ;;  %v845_v3 = vld.sshfl [vmem:[%s1292_s2 + $0x4] sm:$0x33 pattern:$0x76325410]  ;;  %v71_v4 = vsel %vm69_vm0, %v833_v1, 0  ;;  %s939_s9 = smov 113  }
  0x16   :  { %v494_v6 = vcombine.high %v845_v3, %v845_v3  ;;  %v496_v7 = vsel %vm69_vm0, %v845_v3, 0  ;;  %v836_v8 = vld.sshfl [vmem:[%s1291_s1] sm:$0x33 pattern:$0x76325410]  ;;  %178 = vperm.xlu0 %865, %v48_v5   ;;  %s940_s10 = smov 112  }
  0x17   :  { %834 = vmatprep.subr.msk.bf16.mxu0 %vm69_vm0, %v64_v2  ;;  %v125_v9 = vcombine.high %v836_v8, %v836_v8  ;;  %v848_v10 = vld.sshfl [vmem:[%s1291_s1 + $0x4] sm:$0x33 pattern:$0x76325410]  ;;  %v46_v11 = vld [vmem:[%s1294_s4] sm:$0xf] }
  0x18   :  { %846 = vmatprep.subr.msk.bf16.mxu1 %vm69_vm0, %v494_v6  ;;  %77 = vmatpush1.bf16.msra.mxu0 %v71_v4  ;;  %v550_v12 = vcombine.high %v848_v10, %v848_v10  ;;  %v130_v13 = vsel %vm69_vm0, %v836_v8, 0  ;;  %v552_v14 = vsel %vm69_vm0, %v848_v10, 0  ;;  %v45_v15 = vld [vmem:[%s1293_s3] sm:$0xf]  ;;  %s935_s3 = smov 17   ;;  %s936_s4 = smov 15  }
  0x19   :  { %502 = vmatpush1.bf16.msra.mxu1 %v496_v7  ;;  %837 = vmatprep.subr.msk.bf16.mxu0 %vm69_vm0, %v125_v9  ;;  %s941_s11 = smov 111   ;;  %vm423_vm14 = vcmask 1043456   ;;  %vm419_vm15 = vcmask 588800   ;;  %s942_s17 = smov [#allocation6]  }
  0x1a   :  { %849 = vmatprep.subr.msk.bf16.mxu1 %vm69_vm0, %v550_v12  ;;  %s821_s18 = sshll.u32 %s942_s17, 4  ;;  %s822_s18 = int_to_ptr.vmem [resolvable:$true] %s821_s18 }
  0x1b   :  { %835 = vmatmul.mubr.msk.bf16.vlgmr.msra.gmra.mrb[0].mxu0 %vm65_vm1, %v46_v11  ;;  %p910_p9 = scmp.lt.s32.totalorder %s822_s18, %s822_s18 }
  0x1c   :  { %847 = vmatmul.mubr.msk.bf16.vlgmr.msra.gmra.mrb[0].mxu1 %vm65_vm1, %v46_v11  ;;  %136 = vmatpush1.bf16.msra.mxu0 %v130_v13 }
  0x1d   :  { %558 = vmatpush1.bf16.msra.mxu1 %v552_v14  ;;  %167 = vmatprep.mubr.bf16.mxu0 %v934_v0 }
  0x1e   :  { %589 = vmatprep.mubr.bf16.mxu1 %v934_v0 }
  0x23   :  { %838 = vmatmul.mubr.msk.bf16.vlgmr.msra.gmra.mrb[4].mxu0 %vm65_vm1, %v45_v15 }
  0x24   :  { %850 = vmatmul.mubr.msk.bf16.vlgmr.msra.gmra.mrb[4].mxu1 %vm65_vm1, %v45_v15  ;;  %462 = vmatprep.mubr.bf16.mxu0 %v934_v0 }
  0x25   :  { %800 = vmatprep.mubr.bf16.mxu1 %v934_v0 }
  0x95   :  { %v179_v25 = vpop.permute.xlu0 %178 }
  0xee   :  { %v110_v16 = vpop.f32.mrb[0].mxu0 }
  0xef   :  { %v112_v17 = vpop.f32.mrb[1].mxu0  ;;  %v535_v18 = vpop.f32.mrb[0].mxu1 }
  0xf0   :  { %v114_v19 = vpop.f32.mrb[2].mxu0  ;;  %v537_v20 = vpop.f32.mrb[1].mxu1 }
  0xf1   :  { %v115_v21 = vpop.f32.mrb[3].mxu0  ;;  %v539_v22 = vpop.f32.mrb[2].mxu1 }
  0xf2   :  { %v540_v23 = vpop.f32.mrb[3].mxu1 }
  0xf6   :  { %v169_v24 = vpop.f32.mrb[4].mxu0 }
  0xf7   :  { %v170_v26 = vadd.f32 %v169_v24, %v110_v16  ;;  %v591_v27 = vpop.f32.mrb[4].mxu1  ;;  %v171_v28 = vpop.f32.mrb[5].mxu0 }
  0xf8   :  { %v592_v29 = vadd.f32 %v591_v27, %v535_v18  ;;  %v172_v30 = vadd.f32 %v171_v28, %v112_v17  ;;  %v593_v31 = vpop.f32.mrb[5].mxu1  ;;  %v173_v32 = vpop.f32.mrb[6].mxu0 }
  0xf9   :  { %v594_v33 = vadd.f32 %v593_v31, %v537_v20  ;;  %v1032_v34 = vadd.f32 %v179_v25, %v170_v26  ;;  %v174_v35 = vpop.f32.mrb[7].mxu0  ;;  %v595_v36 = vpop.f32.mrb[6].mxu1 }
  0xfa   :  { %v1034_v37 = vadd.f32 %v179_v25, %v172_v30  ;;  %v1036_v38 = vadd.f32 %v592_v29, %v179_v25  ;;  %v596_v39 = vpop.f32.mrb[7].mxu1 }
  0xfb   :  { %v1039_v40 = vmul.f32 0.70710677, %v1032_v34  ;;  %v1041_v41 = vadd.f32 %v594_v33, %v179_v25 }
  0xfc   :  { %v1044_v42 = vmul.f32 0.70710677, %v1034_v37  ;;  %v1047_v43 = vmul.f32 0.70710677, %v1036_v38 }
  0xfd   :  { %v187_v44 = vand.u32 2147483647, %v1039_v40  ;;  %v1051_v45 = vmul.f32 0.70710677, %v1041_v41  ;;  %vm225_vm2 = vcmp.ge.f32.partialorder %v1039_v40, 0.0 }
  0xfe   :  { %v188_v46 = vand.u32 2147483647, %v1044_v42  ;;  %v604_v47 = vand.u32 2147483647, %v1047_v43  ;;  %vm226_vm3 = vcmp.ge.f32.partialorder %v1044_v42, 0.0  ;;  %vm642_vm4 = vcmp.ge.f32.partialorder %v1047_v43, 0.0 }
  0xff   :  { %v189_v48 = vmul.f32 0.3275911, %v187_v44  ;;  %v605_v49 = vand.u32 2147483647, %v1051_v45  ;;  %v213_v57 = vsub.f32 0.0, %v187_v44  ;;  %vm643_vm5 = vcmp.ge.f32.partialorder %v1051_v45, 0.0 }
 0x100   :  { %v190_v50 = vmul.f32 0.3275911, %v188_v46  ;;  %v606_v51 = vmul.f32 0.3275911, %v604_v47  ;;  %v214_v58 = vsub.f32 0.0, %v188_v46  ;;  %v630_v61 = vsub.f32 0.0, %v604_v47 }
 0x101   :  { %v191_v52 = vadd.f32 1.0, %v189_v48  ;;  %v607_v53 = vmul.f32 0.3275911, %v605_v49  ;;  %v215_v60 = vmul.f32 %v213_v57, %v187_v44  ;;  %v631_v1 = vsub.f32 0.0, %v605_v49 }
 0x102   :  { %v192_v54 = vadd.f32 1.0, %v190_v50  ;;  %v608_v55 = vadd.f32 1.0, %v606_v51  ;;  %v216_v0 = vmul.f32 %v214_v58, %v188_v46  ;;  %v632_v7 = vmul.f32 %v630_v61, %v604_v47 }
 0x103   :  { %867 = vrcp.f32 %v191_v52  ;;  %v609_v56 = vadd.f32 1.0, %v607_v53  ;;  %v217_v6 = vmul.f32 1.442695, %v215_v60  ;;  %v633_v12 = vmul.f32 %v631_v1, %v605_v49 }
 0x104   :  { %869 = vrcp.f32 %v192_v54  ;;  %v219_v10 = vmul.f32 1.442695, %v216_v0  ;;  %v634_v19 = vmul.f32 1.442695, %v632_v7  ;;  %v600_v42 = vmul.f32 0.5, %v1036_v38  ;;  %v49_v38 = vld [vmem:[%s1297_s7] sm:$0xff] }
 0x105   :  { %871 = vrcp.f32 %v608_v55  ;;  %v636_v22 = vmul.f32 1.442695, %v633_v12  ;;  %v601_v45 = vmul.f32 0.5, %v1041_v41 }
 0x106   :  { %873 = vrcp.f32 %v609_v56 }
 0x107   :  { %875 = vpow2.f32 %v217_v6 }
 0x108   :  { %877 = vpow2.f32 %v219_v10 }
 0x109   :  { %879 = vpow2.f32 %v634_v19 }
 0x10a   :  { %881 = vpow2.f32 %v636_v22 }
 0x10d   :  { %v868_v59 = vpop.eup %867 }
 0x10e   :  { %v870_v62 = vpop.eup %869  ;;  %v195_v63 = vmul.f32 1.0614054, %v868_v59 }
 0x10f   :  { %v196_v2 = vmul.f32 1.0614054, %v870_v62  ;;  %v872_v4 = vpop.eup %871 }
 0x110   :  { %v197_v3 = vadd.f32 -1.4531521, %v195_v63  ;;  %v874_v8 = vpop.eup %873  ;;  %v612_v11 = vmul.f32 1.0614054, %v872_v4 }
 0x111   :  { %v198_v5 = vadd.f32 -1.4531521, %v196_v2  ;;  %v613_v14 = vmul.f32 1.0614054, %v874_v8  ;;  %v876_v47 = vpop.eup %875 }
 0x112   :  { %v199_v9 = vmul.f32 %v868_v59, %v197_v3  ;;  %v614_v16 = vadd.f32 -1.4531521, %v612_v11  ;;  %v878_v50 = vpop.eup %877  ;;  %v183_v3 = vmul.f32 0.5, %v1032_v34  ;;  %v184_v11 = vmul.f32 0.5, %v1034_v37 }
 0x113   :  { %v200_v13 = vmul.f32 %v870_v62, %v198_v5  ;;  %v615_v18 = vadd.f32 -1.4531521, %v613_v14  ;;  %v880_v57 = vpop.eup %879 }
 0x114   :  { %v201_v15 = vadd.f32 1.4214138, %v199_v9  ;;  %v616_v21 = vmul.f32 %v872_v4, %v614_v16  ;;  %v882_v61 = vpop.eup %881  ;;  %v239_v16 = vlaneseq }
 0x115   :  { %v202_v17 = vadd.f32 1.4214138, %v200_v13  ;;  %v617_v24 = vmul.f32 %v874_v8, %v615_v18 }
 0x116   :  { %v203_v20 = vmul.f32 %v868_v59, %v201_v15  ;;  %v618_v26 = vadd.f32 1.4214138, %v616_v21  ;;  %v1119_v18 = vshrl.u32 %v239_v16, 7 }
 0x117   :  { %v204_v23 = vmul.f32 %v870_v62, %v202_v17  ;;  %v619_v28 = vadd.f32 1.4214138, %v617_v24 }
 0x118   :  { %v205_v25 = vadd.f32 -0.28449672, %v203_v20  ;;  %v620_v30 = vmul.f32 %v872_v4, %v618_v26  ;;  %v1123_v20 = vand.u32 127, %v239_v16  ;;  %v246_v21 = vsub.s32 0, %v1119_v18  ;;  %v1130_v26 = vld [vmem:[#allocation3 + $0x8] sm:$0xff] }
 0x119   :  { %v206_v27 = vadd.f32 -0.28449672, %v204_v23  ;;  %v621_v32 = vmul.f32 %v874_v8, %v619_v28  ;;  %v265_v22 = vsub.s32 1, %v1119_v18 }
 0x11a   :  { %v207_v29 = vmul.f32 %v868_v59, %v205_v25  ;;  %v622_v35 = vadd.f32 -0.28449672, %v620_v30  ;;  %vm241_vm6 = vcmp.lt.s32.totalorder %v1123_v20, 17  ;;  %v1128_v25 = vld [vmem:[#allocation3] sm:$0xff]  ;;  %v1136_v28 = vrot.slane %v1130_v26, %v246_v21 }
 0x11b   :  { %v208_v31 = vmul.f32 %v870_v62, %v206_v27  ;;  %v623_v39 = vadd.f32 -0.28449672, %v621_v32  ;;  %v1133_v27 = vrot.slane %v1128_v25, %v246_v21  ;;  %vm260_vm7 = vcmp.lt.s32.totalorder %v1123_v20, 16 }
 0x11c   :  { %v209_v33 = vadd.f32 0.2548296, %v207_v29  ;;  %v624_v46 = vmul.f32 %v872_v4, %v622_v35  ;;  %v1147_v32 = vrot.slane %v1130_v26, %v265_v22  ;;  %vm279_vm8 = vcmp.lt.s32.totalorder %v1123_v20, 15 }
 0x11d   :  { %v210_v36 = vadd.f32 0.2548296, %v208_v31  ;;  %v625_v49 = vmul.f32 %v874_v8, %v623_v39  ;;  %v1144_v31 = vrot.slane %v1128_v25, %v265_v22  ;;  %vm298_vm9 = vcmp.lt.s32.totalorder %v1123_v20, 1 }
 0x11e   :  { %v211_v44 = vmul.f32 %v868_v59, %v209_v33  ;;  %v626_v52 = vadd.f32 0.2548296, %v624_v46  ;;  %vm319_vm10 = vcmp.lt.s32.totalorder %v1123_v20, 127  ;;  %vm357_vm11 = vcmp.lt.s32.totalorder %v1123_v20, 112 }
 0x11f   :  { %v212_v48 = vmul.f32 %v870_v62, %v210_v36  ;;  %v627_v54 = vadd.f32 0.2548296, %v625_v49  ;;  %vm338_vm12 = vcmp.lt.s32.totalorder %v1123_v20, 113  ;;  %vm376_vm13 = vcmp.lt.s32.totalorder %v1123_v20, 111 }
 0x120   :  { %v221_v51 = vmul.f32 %v876_v47, %v211_v44  ;;  %v628_v56 = vmul.f32 %v872_v4, %v626_v52 }
 0x121   :  { %v222_v53 = vmul.f32 %v878_v50, %v212_v48  ;;  %v629_v60 = vmul.f32 %v874_v8, %v627_v54 }
 0x122   :  { %v223_v55 = vsub.f32 1.0, %v221_v51  ;;  %v638_v0 = vmul.f32 %v880_v57, %v628_v56  ;;  %v303_v56 = vsub.s32 3, %v1119_v18 }
 0x123   :  { %v224_v58 = vsub.f32 1.0, %v222_v53  ;;  %v639_v1 = vmul.f32 %v882_v61, %v629_v60 }
 0x124   :  { %v227_v63 = vsub.f32 0.0, %v223_v55  ;;  %v640_v2 = vsub.f32 1.0, %v638_v0 }
 0x125   :  { %v228_v59 = vsub.f32 0.0, %v224_v58  ;;  %v641_v7 = vsub.f32 1.0, %v639_v1  ;;  %v308_v1 = vrot.slane %v1130_v26, %v303_v56 }
 0x126   :  { %v229_v62 = vsel %vm225_vm2, %v223_v55, %v227_v63  ;;  %v644_v4 = vsub.f32 0.0, %v640_v2  ;;  %v284_v55 = vsub.s32 2, %v1119_v18 }
 0x127   :  { %v230_v5 = vsel %vm226_vm3, %v224_v58, %v228_v59  ;;  %v231_v6 = vadd.f32 1.0, %v229_v62  ;;  %v645_v8 = vsub.f32 0.0, %v641_v7  ;;  %v304_v59 = vrot.slane %v1128_v25, %v303_v56 }
 0x128   :  { %v232_v9 = vadd.f32 1.0, %v230_v5  ;;  %v646_v40 = vsel %vm642_vm4, %v640_v2, %v644_v4  ;;  %v1165_v60 = vrot.slane %v1128_v25, %v284_v55  ;;  %v289_v0 = vrot.slane %v1130_v26, %v284_v55 }
 0x129   :  { %v1059_v10 = vmul.f32 %v231_v6, %v183_v3  ;;  %v647_v12 = vsel %vm643_vm5, %v641_v7, %v645_v8  ;;  %v648_v13 = vadd.f32 1.0, %v646_v40 }
 0x12a   :  { %v1069_v34 = vmul.f32 %v232_v9, %v184_v11  ;;  %v649_v43 = vadd.f32 1.0, %v647_v12  ;;  %v324_v11 = vsub.s32 5, %v1119_v18 }
 0x12b   :  { %256 = vrot.lane.b32.xlu1 %v1059_v10, %s933_s16  ;;  %235 = vrot.lane.b32.xlu0 %v1059_v10, %s935_s3  ;;  %v1071_v14 = vmul.f32 %v648_v13, %v600_v42 }
 0x12c   :  { %v1078_v37 = vmul.f32 %v649_v43, %v601_v45  ;;  %v325_v13 = vrot.slane %v1128_v25, %v324_v11  ;;  %v329_v43 = vrot.slane %v1130_v26, %v324_v11 }
 0x12f   :  { %652 = vrot.lane.b32.xlu1 %v1071_v14, %s935_s3  ;;  %258 = vrot.lane.b32.xlu0 %v1069_v34, %s933_s16 }
 0x133   :  { %662 = vrot.lane.b32.xlu1 %v1071_v14, %s933_s16  ;;  %654 = vrot.lane.b32.xlu0 %v1078_v37, %s935_s3 }
 0x137   :  { %275 = vrot.lane.b32.xlu1 %v1059_v10, %s936_s4  ;;  %664 = vrot.lane.b32.xlu0 %v1078_v37, %s933_s16 }
 0x13b   :  { %294 = vrot.lane.b32.xlu1 %v1059_v10, %s937_s29  ;;  %277 = vrot.lane.b32.xlu0 %v1069_v34, %s936_s4 }
 0x13f   :  { %672 = vrot.lane.b32.xlu1 %v1071_v14, %s936_s4  ;;  %296 = vrot.lane.b32.xlu0 %v1069_v34, %s937_s29 }
 0x143   :  { %682 = vrot.lane.b32.xlu1 %v1071_v14, %s937_s29  ;;  %674 = vrot.lane.b32.xlu0 %v1078_v37, %s936_s4 }
 0x147   :  { %315 = vrot.lane.b32.xlu1 %v1059_v10, %s938_s30  ;;  %684 = vrot.lane.b32.xlu0 %v1078_v37, %s937_s29 }
 0x14b   :  { %694 = vrot.lane.b32.xlu1 %v1071_v14, %s938_s30  ;;  %317 = vrot.lane.b32.xlu0 %v1069_v34, %s938_s30 }
 0x14f   :  { %334 = vrot.lane.b32.xlu1 %v1059_v10, %s939_s9  ;;  %696 = vrot.lane.b32.xlu0 %v1078_v37, %s938_s30 }
 0x153   :  { %353 = vrot.lane.b32.xlu1 %v1059_v10, %s940_s10  ;;  %336 = vrot.lane.b32.xlu0 %v1069_v34, %s939_s9 }
 0x157   :  { %237 = vrot.lane.b32.xlu1 %v1069_v34, %s935_s3  ;;  %355 = vrot.lane.b32.xlu0 %v1069_v34, %s940_s10 }
 0x15b   :  { %704 = vrot.lane.b32.xlu1 %v1071_v14, %s939_s9  ;;  %706 = vrot.lane.b32.xlu0 %v1078_v37, %s939_s9 }
 0x15f   :  { %714 = vrot.lane.b32.xlu1 %v1071_v14, %s940_s10  ;;  %716 = vrot.lane.b32.xlu0 %v1078_v37, %s940_s10 }
 0x163   :  { %372 = vrot.lane.b32.xlu1 %v1059_v10, %s941_s11  ;;  %374 = vrot.lane.b32.xlu0 %v1069_v34, %s941_s11 }
 0x167   :  { %724 = vrot.lane.b32.xlu1 %v1071_v14, %s941_s11  ;;  %726 = vrot.lane.b32.xlu0 %v1078_v37, %s941_s11 }
 0x16b   :  { %475 = vperm.xlu1 %866, %v49_v38  }
 0x19d   :  { %v1115_v41 = vpop.permute.xlu1 %256  ;;  %v1117_v15 = vpop.permute.xlu0 %235 }
 0x1a1   :  { %v653_v17 = vpop.permute.xlu1 %652  ;;  %v1121_v19 = vpop.permute.xlu0 %258 }
 0x1a5   :  { %v663_v23 = vpop.permute.xlu1 %662  ;;  %v655_v24 = vpop.permute.xlu0 %654 }
 0x1a6   :  { %v656_v29 = vsel %vm241_vm6, %v653_v17, %v655_v24  ;;  %v657_v30 = vsel %vm241_vm6, %v655_v24, %v653_v17 }
 0x1a7   :  { %v658_v44 = vmul.f32 %v657_v30, %v1133_v27  ;;  %v659_v46 = vmul.f32 %v656_v29, %v1136_v28 }
 0x1a9   :  { %v1149_v33 = vpop.permute.xlu1 %275  ;;  %v665_v35 = vpop.permute.xlu0 %664 }
 0x1aa   :  { %v666_v36 = vsel %vm260_vm7, %v663_v23, %v665_v35  ;;  %v667_v39 = vsel %vm260_vm7, %v665_v35, %v663_v23  ;;  %v262_v35 = vsel %vm260_vm7, %v1121_v19, %v1115_v41 }
 0x1ab   :  { %v668_v47 = vmul.f32 %v667_v39, %v1144_v31  ;;  %v669_v48 = vmul.f32 %v666_v36, %v1147_v32  ;;  %v261_v36 = vsel %vm260_vm7, %v1115_v41, %v1121_v19 }
 0x1ac   :  { %v272_v55 = vmul.f32 %v1147_v32, %v261_v36 }
 0x1ad   :  { %v752_v49 = vpack.c.bf16 %v668_v47, %v658_v44  ;;  %v295_v50 = vpop.permute.xlu1 %294  ;;  %v1159_v51 = vpop.permute.xlu0 %277  ;;  %v753_v52 = vpack.c.bf16 %v669_v48, %v659_v46  ;;  %v271_v44 = vmul.f32 %v1144_v31, %v262_v35  ;;  %v343_v47 = vsub.s32 6, %v1119_v18 }
 0x1ae   :  { %v280_v46 = vsel %vm279_vm8, %v1149_v33, %v1159_v51 }
 0x1af   :  { %768 = vmatprep.subr.bf16.mxu1 %v753_v52 }
 0x1b0   :  { %769 = vmatpush1.bf16.msra.mxu1 %v752_v49  ;;  %v362_v49 = vsub.s32 7, %v1119_v18 }
 0x1b1   :  { %v673_v53 = vpop.permute.xlu1 %672  ;;  %v297_v54 = vpop.permute.xlu0 %296 }
 0x1b2   :  { %v299_v39 = vsel %vm298_vm9, %v295_v50, %v297_v54  ;;  %v300_v41 = vsel %vm298_vm9, %v297_v54, %v295_v50  ;;  %v281_v50 = vsel %vm279_vm8, %v1159_v51, %v1149_v33  ;;  %v291_v54 = vmul.f32 %v289_v0, %v280_v46 }
 0x1b3   :  { %v310_v56 = vmul.f32 %v308_v1, %v299_v39  ;;  %v290_v33 = vmul.f32 %v1165_v60, %v281_v50  ;;  %v348_v51 = vrot.slane %v1130_v26, %v343_v47 }
 0x1b5   :  { %v683_v57 = vpop.permute.xlu1 %682  ;;  %v675_v58 = vpop.permute.xlu0 %674 }
 0x1b6   :  { %v676_v61 = vsel %vm279_vm8, %v673_v53, %v675_v58  ;;  %v677_v63 = vsel %vm279_vm8, %v675_v58, %v673_v53  ;;  %v309_v58 = vmul.f32 %v304_v59, %v300_v41 }
 0x1b7   :  { %v678_v6 = vmul.f32 %v677_v63, %v1165_v60  ;;  %v679_v7 = vmul.f32 %v676_v61, %v289_v0 }
 0x1b9   :  { %v316_v62 = vpop.permute.xlu1 %315  ;;  %v685_v2 = vpop.permute.xlu0 %684 }
 0x1ba   :  { %v686_v3 = vsel %vm298_vm9, %v683_v57, %v685_v2  ;;  %v687_v5 = vsel %vm298_vm9, %v685_v2, %v683_v57 }
 0x1bb   :  { %v688_v4 = vmul.f32 %v687_v5, %v304_v59  ;;  %v689_v9 = vmul.f32 %v686_v3, %v308_v1  ;;  %v412_v59 = vpack.c.bf16 %v310_v56, %v291_v54  ;;  %v363_v1 = vrot.slane %v1128_v25, %v362_v49 }
 0x1bd   :  { %v754_v8 = vpack.c.bf16 %v688_v4, %v678_v6  ;;  %v695_v40 = vpop.permute.xlu1 %694  ;;  %v318_v42 = vpop.permute.xlu0 %317  ;;  %v755_v12 = vpack.c.bf16 %v689_v9, %v679_v7  ;;  %v411_v6 = vpack.c.bf16 %v309_v58, %v290_v33  ;;  %v47_v58 = vld [vmem:[%s1296_s6] sm:$0xf]  ;;  %s905_s6 = scalar_lea.vmem %s822_s18, 512 }
 0x1be   :  { %v321_v19 = vsel %vm319_vm10, %v318_v42, %v316_v62  ;;  %v320_v32 = vsel %vm319_vm10, %v316_v62, %v318_v42  ;;  %p906_p8 = scmp.ne.s32.totalorder %s822_s18, %s905_s6  ;;  %p911_p10 = scmp.lt.s32.totalorder %s905_s6, %s905_s6 }
 0x1bf   :  { %770 = vmatprep.subr.bf16.mxu1 %v755_v12  ;;  %v331_v61 = vmul.f32 %v329_v43, %v321_v19  ;;  %v330_v60 = vmul.f32 %v325_v13, %v320_v32 }
 0x1c0   :  { %771 = vmatpush1.bf16.msra.mxu1 %v754_v8  ;;  %p912_p11 = por %p911_p10, %p910_p9 }
 0x1c1   :  { %v1184_v45 = vpop.permute.xlu1 %334  ;;  %v697_v38 = vpop.permute.xlu0 %696  ;;  %v413_v35 = vpack.c.bf16 %v330_v60, %v1059_v10 }
 0x1c2   :  { %v698_v16 = vsel %vm319_vm10, %v695_v40, %v697_v38  ;;  %v699_v17 = vsel %vm319_vm10, %v697_v38, %v695_v40  ;;  %v839_v38 = vld [vmem:[#allocation3 + $0x10] ss:$0 sm:$0xff]  ;;  %p913_p12 = pnand %p912_p11, %p906_p8 }
 0x1c3   :  { %v700_v21 = vmul.f32 %v698_v16, %v325_v13  ;;  %v701_v22 = vmul.f32 %v699_v17, %v329_v43  ;;  %v840_v16 = vld [vmem:[#allocation3 + $0x18] ss:$0 sm:$0xff] }
 0x1c5   :  { %v756_v23 = vpack.c.bf16 %v700_v21, %v1071_v14  ;;  %v354_v24 = vpop.permute.xlu1 %353  ;;  %v1191_v29 = vpop.permute.xlu0 %336  ;;  %v757_v30 = vpack.c.bf16 %v701_v22, %v1078_v37 }
 0x1c6   :  { %v339_v17 = vsel %vm338_vm12, %v1184_v45, %v1191_v29 }
 0x1c7   :  { %772 = vmatprep.subr.bf16.mxu1 %v757_v30 }
 0x1c8   :  { %773 = vmatpush1.bf16.msra.mxu1 %v756_v23 }
 0x1c9   :  { %v238_v48 = vpop.permute.xlu1 %237  ;;  %v356_v52 = vpop.permute.xlu0 %355 }
 0x1ca   :  { %v242_v31 = vsel %vm241_vm6, %v1117_v15, %v238_v48  ;;  %v243_v53 = vsel %vm241_vm6, %v238_v48, %v1117_v15  ;;  %v359_v0 = vsel %vm357_vm11, %v356_v52, %v354_v24  ;;  %v358_v9 = vsel %vm357_vm11, %v354_v24, %v356_v52 }
 0x1cb   :  { %v252_v18 = vmul.f32 %v1133_v27, %v243_v53  ;;  %v253_v57 = vmul.f32 %v1136_v28, %v242_v31  ;;  %v344_v27 = vrot.slane %v1128_v25, %v343_v47  ;;  %v367_v28 = vrot.slane %v1130_v26, %v362_v49 }
 0x1cc   :  { %v340_v26 = vsel %vm338_vm12, %v1191_v29, %v1184_v45  ;;  %v414_v25 = vpack.c.bf16 %v331_v61, %v1069_v34  ;;  %v368_v36 = vmul.f32 %v363_v1, %v358_v9 }
 0x1cd   :  { %v409_v63 = vpack.c.bf16 %v271_v44, %v252_v18  ;;  %v705_v2 = vpop.permute.xlu1 %704  ;;  %v707_v15 = vpop.permute.xlu0 %706  ;;  %v410_v3 = vpack.c.bf16 %v272_v55, %v253_v57  ;;  %v369_v8 = vmul.f32 %v367_v28, %v359_v0  ;;  %v350_v21 = vmul.f32 %v348_v51, %v340_v26 }
 0x1ce   :  { %v708_v62 = vsel %vm338_vm12, %v705_v2, %v707_v15  ;;  %v709_v5 = vsel %vm338_vm12, %v707_v15, %v705_v2  ;;  %v349_v45 = vmul.f32 %v344_v27, %v339_v17 }
 0x1cf   :  { %430 = vmatprep.subr.bf16.mxu0 %v410_v3  ;;  %v710_v42 = vmul.f32 %v708_v62, %v344_v27  ;;  %v711_v12 = vmul.f32 %v709_v5, %v348_v51  ;;  %v416_v48 = vpack.c.bf16 %v369_v8, %v350_v21 }
 0x1d0   :  { %431 = vmatpush1.bf16.msra.mxu0 %v409_v63  ;;  %v415_v52 = vpack.c.bf16 %v368_v36, %v349_v45 }
 0x1d1   :  { %v715_v7 = vpop.permute.xlu1 %714  ;;  %432 = vmatprep.subr.bf16.mxu0 %v412_v59  ;;  %v717_v4 = vpop.permute.xlu0 %716 }
 0x1d2   :  { %v718_v40 = vsel %vm357_vm11, %v715_v7, %v717_v4  ;;  %v719_v11 = vsel %vm357_vm11, %v717_v4, %v715_v7 }
 0x1d3   :  { %v720_v13 = vmul.f32 %v718_v40, %v363_v1  ;;  %v721_v43 = vmul.f32 %v719_v11, %v367_v28 }
 0x1d4   :  { %433 = vmatpush1.bf16.msra.mxu0 %v411_v6 }
 0x1d5   :  { %v758_v22 = vpack.c.bf16 %v720_v13, %v710_v42  ;;  %v373_v23 = vpop.permute.xlu1 %372  ;;  %434 = vmatprep.subr.bf16.mxu0 %v414_v25  ;;  %v375_v24 = vpop.permute.xlu0 %374  ;;  %v759_v30 = vpack.c.bf16 %v721_v43, %v711_v12 }
 0x1d6   :  { %v377_v39 = vsel %vm376_vm13, %v373_v23, %v375_v24  ;;  %v378_v44 = vsel %vm376_vm13, %v375_v24, %v373_v23 }
 0x1d7   :  { %v387_v46 = vmul.f32 %v839_v38, %v377_v39  ;;  %v388_v47 = vmul.f32 %v840_v16, %v378_v44  ;;  %774 = vmatprep.subr.bf16.mxu1 %v759_v30 }
 0x1d8   :  { %435 = vmatpush1.bf16.msra.mxu0 %v413_v35  ;;  %775 = vmatpush1.bf16.msra.mxu1 %v758_v22 }
 0x1d9   :  { %v725_v29 = vpop.permute.xlu1 %724  ;;  %436 = vmatprep.subr.bf16.mxu0 %v416_v48  ;;  %v727_v49 = vpop.permute.xlu0 %726  ;;  %v417_v31 = vpack.c.bf16 %v387_v46, %v387_v46  ;;  %v418_v53 = vpack.c.bf16 %v388_v47, %v388_v47 }
 0x1da   :  { %v728_v41 = vsel %vm376_vm13, %v725_v29, %v727_v49  ;;  %v729_v19 = vsel %vm376_vm13, %v727_v49, %v725_v29 }
 0x1db   :  { %v730_v55 = vmul.f32 %v839_v38, %v728_v41  ;;  %v731_v56 = vmul.f32 %v840_v16, %v729_v19  ;;  %v425_v50 = vsel %vm423_vm14, %v417_v31, 0 }
 0x1dc   :  { %437 = vmatpush1.bf16.msra.mxu0 %v415_v52 }
 0x1dd   :  { %v760_v18 = vpack.c.bf16 %v730_v55, %v730_v55  ;;  %v761_v57 = vpack.c.bf16 %v731_v56, %v731_v56  ;;  %841 = vmatprep.subr.msk.bf16.mxu0 %vm423_vm14, %v418_v53 }
 0x1df   :  { %851 = vmatprep.subr.msk.bf16.mxu1 %vm423_vm14, %v761_v57  ;;  %v763_v54 = vsel %vm423_vm14, %v760_v18, 0 }
 0x1e0   :  { %439 = vmatpush1.bf16.msra.mxu0 %v425_v50  ;;  %777 = vmatpush1.bf16.msra.mxu1 %v763_v54 }
 0x1e3   :  { %842 = vmatmul.mubr.msk.bf16.vlgmr.msra.gmra.mrb[8].mxu0 %vm419_vm15, %v47_v58  ;;  %852 = vmatmul.mubr.msk.bf16.vlgmr.msra.gmra.mrb[8].mxu1 %vm419_vm15, %v47_v58 }
 0x1ea   :  { %v476_v20 = vpop.permute.xlu1 %475 }
 0x2b6   :  { %v464_v61 = vpop.f32.mrb[8].mxu0  ;;  %v802_v63 = vpop.f32.mrb[8].mxu1 }
 0x2b7   :  { %v471_v2 = vadd.f32 %v464_v61, %v1059_v10  ;;  %v809_v15 = vadd.f32 %v802_v63, %v1071_v14  ;;  %v466_v3 = vpop.f32.mrb[9].mxu0  ;;  %v804_v32 = vpop.f32.mrb[9].mxu1 }
 0x2b8   :  { %v472_v27 = vadd.f32 %v466_v3, %v1069_v34  ;;  %v810_v28 = vadd.f32 %v804_v32, %v1078_v37  ;;  %v468_v33 = vpop.f32.mrb[10].mxu0  ;;  %v806_v51 = vpop.f32.mrb[10].mxu1 }
 0x2b9   :  { %v478_v0 = vadd.f32 %v476_v20, %v471_v2  ;;  %v811_v59 = vadd.f32 %v809_v15, %v476_v20  ;;  %v469_v1 = vpop.f32.mrb[11].mxu0  ;;  %v807_v62 = vpop.f32.mrb[11].mxu1 }
 0x2ba   :  { %v479_v5 = vadd.f32 %v476_v20, %v472_v27  ;;  %v812_v6 = vadd.f32 %v810_v28, %v476_v20 }
 0x2bb   :  { %480 = vst [vmem:[#allocation6] sm:$0xff] %v478_v0  ;;  %814 = vst [vmem:[#allocation6 + $0x10] sm:$0xff] %v811_v59 }
 0x2bc   :  { %481 = vst [vmem:[#allocation6 + $0x8] sm:$0xff] %v479_v5  ;;  %815 = vst [vmem:[#allocation6 + $0x18] sm:$0xff] %v812_v6 }
 0x2bd   :  { %916 = shalt.err (!%p913_p12)
}
 0x2be   :  { %s917_s21 = scalar_lea.hbm %s1298_s8, 512 }
 0x2bf   :  { %p918_p13 = scmp.ne.s32.totalorder %s1298_s8, %s917_s21  ;;  %p921_p0 = scmp.lt.u32.totalorder %s917_s21, %s1298_s8 }
 0x2c1   :  { %p923_p1 = pnand %p921_p0, %p918_p13 }
 0x2c3   :  { %926 = shalt.err (!%p923_p1)
}
 0x2c4   :  { %827 = dma.vmem_to_hbm [thread:$0]  %s822_s18, 512, %s1298_s8, [#allocation5], %s932_s15, %s932_s15, %s933_s16  }
 0x2c5   :  { %929 = dma.done.wait [#allocation5], 512  }
 0x2c6   :  { %930 = vsyncadd [#allocation5], 4294966784 }
 0x2c7   :  { %831 = vsyncpa [#allocation4], 1 }
 0x2c8   :  { %832 = vsyncpa [#allocation5], 1 }

</bundles_post_ra>
